<compile_context>
chip_gen: v6e
topology: v6e:2x2x1
jax: 0.10.0
libtpu: 0.0.40
codegen_flags: <defaults>
</compile_context>

<pallas_src>
import math

import jax
import jax.numpy as jnp
from jax.experimental import pallas as pl
from jax.experimental.pallas import tpu as pltpu


_LANE = 128
_TARGET_BLOCK_BYTES = 2 * 1024 * 1024  # ~2 MiB/block; 2 bufs x (in+out) ~= 8 MiB VMEM


def _elu_plus_one_kernel(x_ref, o_ref):
    """Elementwise phi(x) = elu(x) + 1 = where(x > 0, x + 1, exp(x)).

    Computed in the input dtype (bf16 stays bf16 on bf16-capable VPU/EUP chips).
    The exp argument is clamped to <= 0 so garbage values in a ragged boundary block
    never produce inf/NaN noise (those lanes are discarded on store anyway).
    """
    x = x_ref[...]
    o_ref[...] = jnp.where(x > 0, x + 1, jnp.exp(jnp.minimum(x, 0))).astype(o_ref.dtype)


def _pick_block_rows(rows, width, itemsize):
    """Row-tile targeting ~2 MiB blocks; multiple of 8 sublanes, or the full row dim."""
    block_rows = _TARGET_BLOCK_BYTES // max(1, width * itemsize)
    block_rows = max(8, (block_rows // 8) * 8)
    if rows <= block_rows:
        return rows  # block == full array dim -> always legal, single grid step
    return block_rows


def _run_elu_plus_one_2d(x2d, block_rows):
    rows, width = x2d.shape
    grid = (pl.cdiv(rows, block_rows),)  # ragged last block handled by Pallas
    return pl.pallas_call(
        _elu_plus_one_kernel,
        out_shape=jax.ShapeDtypeStruct((rows, width), x2d.dtype),
        grid=grid,
        in_specs=[pl.BlockSpec((block_rows, width), lambda r: (r, 0))],
        out_specs=pl.BlockSpec((block_rows, width), lambda r: (r, 0)),
        compiler_params=pltpu.CompilerParams(
            dimension_semantics=("parallel",),
        ),
    )(x2d)


def _elu_plus_one(x, block_rows=None):
    """Apply phi(x) = elu(x) + 1 via a lane-dense, row-tiled Pallas TPU kernel."""
    orig_shape = x.shape
    n = math.prod(orig_shape)
    if n == 0:
        return x
    itemsize = jnp.dtype(x.dtype).itemsize

    # Preferred path: zero-copy lane-dense view (rows, W), W a multiple of 128.
    lane_w = 0
    for cand in (1024, 512, 256, _LANE):
        if n % cand == 0:
            lane_w = cand
            break

    if lane_w:
        x2d = x.reshape(n // lane_w, lane_w)
    else:
        # Odd total size: keep the trailing feature dim as the lane axis (block last
        # dim == full array dim -> legal even when D < 128).  Avoids a whole-array
        # pad/copy pass at the cost of masked partial stores.
        d = orig_shape[-1] if len(orig_shape) > 1 else n
        x2d = x.reshape(n // d, d)

    rows, width = x2d.shape
    if block_rows is None:
        block_rows = _pick_block_rows(rows, width, itemsize)
    else:
        block_rows = min(block_rows, rows)

    out2d = _run_elu_plus_one_2d(x2d, block_rows)
    return out2d.reshape(orig_shape)


class FeatureMap:
    """JAX/Pallas port of the FeatureMap interface (elu+1 concrete map)."""

    def __init__(self, query_dims):
        self.query_dims = query_dims

    def new_feature_map(self):
        # Deterministic (non-random) feature map: nothing to resample.
        return

    def __call__(self, x):
        return self.forward(x)

    def forward(self, x):
        """Encode x with phi(x) = elu(x) + 1 via a Pallas TPU kernel.

        x: [..., D] with D == self.query_dims (typically [B, L, D]).
        """
        assert x.shape[-1] == self.query_dims, (x.shape, self.query_dims)
        return _elu_plus_one(x)

    def forward_queries(self, x):
        """Encode the queries `x` using this feature map."""
        return self(x)

    def forward_keys(self, x):
        """Encode the keys `x` using this feature map."""
        return self(x)

    @classmethod
    def factory(cls, *args, **kwargs):
        def inner(query_dims):
            return cls(query_dims, *args, **kwargs)
        return inner


if __name__ == "__main__":
    key = jax.random.PRNGKey(0)

    # Small SASRec-like shapes: batch=2, seq=8, hidden (query_dims)=32, f32.
    B, L, D = 2, 8, 32
    x = jax.random.normal(key, (B, L, D), dtype=jnp.float32)

    fmap = FeatureMap.factory()(query_dims=D)
    fmap.new_feature_map()

    q_feat = fmap.forward_queries(x)
    k_feat = fmap.forward_keys(x)
    jax.block_until_ready((q_feat, k_feat))

    ref = jax.nn.elu(x) + 1.0
    assert q_feat.shape == x.shape and q_feat.dtype == x.dtype
    assert jnp.allclose(q_feat, ref, atol=1e-5), "query feature map mismatch (f32)"
    assert jnp.allclose(k_feat, ref, atol=1e-5), "key feature map mismatch (f32)"

    # bf16 path (native-dtype compute) + odd total size (3*7*48 = 1008, not a multiple
    # of 128) exercising the no-pad, feature-dim-as-lane fallback with masked stores.
    xb = jax.random.normal(jax.random.PRNGKey(1), (3, 7, 48), dtype=jnp.bfloat16)
    fmap_b = FeatureMap.factory()(query_dims=48)
    yb = fmap_b(xb)
    jax.block_until_ready(yb)
    ref_b = jax.nn.elu(xb.astype(jnp.float32)) + 1.0
    assert yb.shape == xb.shape and yb.dtype == xb.dtype
    assert jnp.allclose(yb.astype(jnp.float32), ref_b, atol=3e-2, rtol=3e-2), \
        "feature map mismatch (bf16)"

    # Lane-dense path with a ragged (partial) last block: 19*4*32 = 2432 -> (19, 128)
    # view, forced block_rows=8 -> grid=3 with a 3-row final block.
    xr = jax.random.normal(jax.random.PRNGKey(2), (19, 4, 32), dtype=jnp.float32)
    yr = _elu_plus_one(xr, block_rows=8)
    jax.block_until_ready(yr)
    ref_r = jax.nn.elu(xr) + 1.0
    assert yr.shape == xr.shape and yr.dtype == xr.dtype
    assert jnp.allclose(yr, ref_r, atol=1e-5), "feature map mismatch (ragged grid)"

    print("KERNEL_OK")
</pallas_src>

<mosaic_0001>
module attributes {stable_mosaic.version = 11 : i64} {
  func.func @_elu_plus_one_kernel(%arg0: i32, %arg1: memref<1x512xf32, #tpu.memory_space<vmem>>, %arg2: memref<1x512xf32, #tpu.memory_space<vmem>>) attributes {dimension_semantics = [#tpu.dimension_semantics<parallel>], iteration_bounds = array<i64: 1>, scalar_prefetch = 0 : i64, scratch_operands = 0 : i64, tpu.core_type = #tpu.core_type<tc>, window_params = [{transform_indices = @transform_0, window_bounds = array<i64: 1, 512>}, {transform_indices = @transform_1, window_bounds = array<i64: 1, 512>}]} {
    %c0 = arith.constant 0 : index
    %c0_0 = arith.constant 0 : index
    %0 = vector.load %arg1[%c0, %c0_0] : memref<1x512xf32, #tpu.memory_space<vmem>>, vector<1x512xf32>
    %cst = arith.constant 0.000000e+00 : f32
    %1 = vector.broadcast %cst : f32 to vector<1x512xf32>
    %2 = arith.cmpf ogt, %0, %1 : vector<1x512xf32>
    %cst_1 = arith.constant 1.000000e+00 : f32
    %3 = vector.broadcast %cst_1 : f32 to vector<1x512xf32>
    %4 = arith.addf %0, %3 : vector<1x512xf32>
    %cst_2 = arith.constant 0.000000e+00 : f32
    %5 = vector.broadcast %cst_2 : f32 to vector<1x512xf32>
    %6 = arith.minimumf %0, %5 : vector<1x512xf32>
    %7 = math.exp %6 : vector<1x512xf32>
    %8 = arith.select %2, %4, %7 : vector<1x512xi1>, vector<1x512xf32>
    %c0_3 = arith.constant 0 : index
    %c0_4 = arith.constant 0 : index
    %9 = vector.load %arg2[%c0_3, %c0_4] : memref<1x512xf32, #tpu.memory_space<vmem>>, vector<1x512xf32>
    tpu.vector_store %arg2[%c0_3, %c0_4], %8 {strides = array<i32>} : memref<1x512xf32, #tpu.memory_space<vmem>>, vector<1x512xf32>,
    return
  }
  func.func @transform_0(%arg0: i32) -> (i32, i32) {
    %c0_i32 = arith.constant 0 : i32
    %c0_i32_0 = arith.constant 0 : i32
    return %arg0, %c0_i32 : i32, i32
  }
  func.func @transform_1(%arg0: i32) -> (i32, i32) {
    %c0_i32 = arith.constant 0 : i32
    %c0_i32_0 = arith.constant 0 : i32
    return %arg0, %c0_i32 : i32, i32
  }
}

</mosaic_0001>

<bundles_post_ra>
// kernel: tpu_custom_call.1
= control target key start
LH: loop header
LB: loop body
LE: loop exit
PB: predicated region body
PF: predicated region fallthrough
CT: control target
= control target key end

     0   :  { %6 = vsyncpa [#allocation3], 0  ;;  %s114_s0 = inlined_call_operand.hbm [shape: f32[1,512], index: 0, kind: input, shape index: {}]   ;;  %s115_s1 = inlined_call_operand.hbm [shape: f32[1,512], index: 1, kind: output, shape index: {}]  }
   0x1   :  { %7 = vsyncpa [#allocation4], 0  ;;  %s96_s6 = smov [#allocation2]  }
   0x2   :  { %s14_s7 = sshll.u32 %s96_s6, 4  ;;  %s15_s7 = int_to_ptr.vmem [resolvable:$true] %s14_s7 }
   0x3   :  { %s60_s8 = scalar_lea.vmem %s15_s7, 64  ;;  %p65_p1 = scmp.lt.s32.totalorder %s15_s7, %s15_s7 }
   0x4   :  { %p61_p0 = scmp.ne.s32.totalorder %s15_s7, %s60_s8  ;;  %p66_p2 = scmp.lt.s32.totalorder %s60_s8, %s60_s8 }
   0x6   :  { %p67_p3 = por %p66_p2, %p65_p1 }
   0x8   :  { %p68_p4 = pnand %p67_p3, %p61_p0 }
   0xa   :  { %71 = shalt.err (!%p68_p4)
}
   0xb   :  { %17 = dma.hbm_to_vmem [thread:$0]  %s114_s0, 64, %s15_s7, [#allocation3]  }
   0xc   :  { %92 = dma.done.wait [#allocation3], 64  }
   0xd   :  { %93 = vsyncadd [#allocation3], 4294967232  ;;  %v21_v0 = vld [vmem:[#allocation2] sm:$0xf]  ;;  %v28_v3 = vlaneseq  ;;  %s97_s11 = smov [#allocation5]  }
   0xe   :  { %v24_v1 = vmin.f32 %v21_v0, 0.0  ;;  %v23_v4 = vadd.f32 1.0, %v21_v0  ;;  %s39_s12 = sshll.u32 %s97_s11, 4  ;;  %vm22_vm0 = vcmp.gt.f32.partialorder %v21_v0, 0.0  ;;  %s40_s12 = int_to_ptr.vmem [resolvable:$true] %s39_s12 }
   0xf   :  { %vm30_vm1 = vcmp.lt.s32.totalorder %v28_v3, 512  ;;  %s72_s13 = scalar_lea.vmem %s40_s12, 64  ;;  %p77_p6 = scmp.lt.s32.totalorder %s40_s12, %s40_s12 }
  0x10   :  { %v25_v2 = vmul.f32 1.442695, %v24_v1  ;;  %p73_p5 = scmp.ne.s32.totalorder %s40_s12, %s72_s13  ;;  %p78_p7 = scmp.lt.s32.totalorder %s72_s13, %s72_s13 }
  0x12   :  { %50 = vpow2.f32 %v25_v2  ;;  %p79_p8 = por %p78_p7, %p77_p6 }
  0x14   :  { %p80_p9 = pnand %p79_p8, %p73_p5 }
  0x1f   :  { %v51_v5 = vpop.eup %50 }
  0x20   :  { %v27_v6 = vsel %vm22_vm0, %v23_v4, %v51_v5 }
  0x21   :  { %32 = vst.msk [vmem:[#allocation5] sm:$0xf] %vm30_vm1, %v27_v6 }
  0x22   :  { %83 = shalt.err (!%p80_p9)
}
  0x23   :  { %42 = dma.vmem_to_hbm [thread:$0]  %s40_s12, 64, %s115_s1, [#allocation4]  }
  0x24   :  { %94 = dma.done.wait [#allocation4], 64  }
  0x25   :  { %95 = vsyncadd [#allocation4], 4294967232 }
  0x26   :  { %46 = vsyncpa [#allocation3], 1 }
  0x27   :  { %47 = vsyncpa [#allocation4], 1 }

</bundles_post_ra>
